<compile_context>
chip_gen: v7x
topology: tpu7x:2x2x1
jax: 0.10.0
libtpu: 0.0.40
codegen_flags: <defaults>
</compile_context>

<pallas_src>
import functools
import math

import jax
import jax.numpy as jnp
import numpy as np
from jax import lax
from jax.experimental import pallas as pl
from jax.experimental.pallas import tpu as pltpu  # noqa: F401  (TPU backend)


def _round_up(x, m):
    return ((x + m - 1) // m) * m


def _layout(D, H, B, Sq, Sk):
    """Static layout of the single packed parameter buffer (rows x W lanes)."""
    band = _round_up(H, 128)          # one 128-aligned lane band per projection
    W = 3 * band                      # packed buffer lane width (q|k|v bands)
    Wo = _round_up(D, 128)            # lane-dense output width
    assert Wo <= W
    Nq, Nk = B * Sq, B * Sk
    r_bqkv = _round_up(D, 8)          # wqkv occupies rows [0, D)
    r_wo = r_bqkv + 8                 # bias row padded to a full sublane block
    r_bo = r_wo + _round_up(H, 8)
    r_mask = r_bo + 8
    rows = r_mask + _round_up(Nq, 8)
    return dict(D=D, H=H, band=band, W=W, Wo=Wo, Nq=Nq, Nk=Nk,
                r_bqkv=r_bqkv, r_wo=r_wo, r_bo=r_bo, r_mask=r_mask, rows=rows)


def _mha_kernel(x_ref, p_ref, o_ref, *, D, H, band, Wo, Nq, Nk,
                r_bqkv, r_wo, r_bo, r_mask):
    x = x_ref[...]                                        # (Nq+Nk, D)

    # Fused Q/K/V projection: ONE MXU pass over [q2; k2].
    # 1/sqrt(H) is already folded into the wq/bq columns of the packed buffer.
    wqkv = p_ref[0:D, :]                                  # (D, 3*band)
    bqkv = p_ref[r_bqkv:r_bqkv + 1, :]                    # (1, 3*band)
    proj = jnp.dot(x, wqkv, preferred_element_type=jnp.float32) + bqkv

    qh = proj[:Nq, 0:H]                                   # (Nq, H)
    kh = proj[Nq:, band:band + H]                         # (Nk, H)
    vh = proj[Nq:, 2 * band:2 * band + H]                 # (Nk, H)

    # Scores over the flattened batch; contract on the last dim of both
    # operands (no explicit kh.T), then add the precomputed block-diagonal
    # mask (0 / -1e30) straight out of the packed buffer.
    scores = lax.dot_general(
        qh, kh, dimension_numbers=(((1,), (1,)), ((), ())),
        preferred_element_type=jnp.float32)               # (Nq, Nk)
    scores = scores + p_ref[r_mask:r_mask + Nq, 0:Nk]

    # Numerically stable softmax; approx reciprocal runs on the EUP slot.
    m = jnp.max(scores, axis=-1, keepdims=True)
    e = jnp.exp(scores - m)
    attn = e * pl.reciprocal(jnp.sum(e, axis=-1, keepdims=True), approx=True)

    ctx = jnp.dot(attn, vh, preferred_element_type=jnp.float32)   # (Nq, H)

    # Lane-dense output projection: wo/bo are zero-padded to Wo (=128) lanes,
    # so the final matmul + store are unmasked 128-lane operations.
    wo = p_ref[r_wo:r_wo + H, 0:Wo]                       # (H, Wo)
    bo = p_ref[r_bo:r_bo + 1, 0:Wo]                       # (1, Wo)
    out = jnp.dot(ctx, wo, preferred_element_type=jnp.float32) + bo
    o_ref[...] = out.astype(o_ref.dtype)


def multi_head_attention(q, k, packed_buf):
    """q: (B, Sq, D), k: (B, Sk, D), packed_buf from pack_params().
    Returns (B, Sq, D)."""
    B, Sq, D = q.shape
    Bk, Sk, Dk = k.shape
    assert Bk == B and Dk == D
    H = 2 * D
    lay = _layout(D, H, B, Sq, Sk)
    assert packed_buf.shape == (lay["rows"], lay["W"]), \
        "packed buffer does not match (B, Sq, Sk, D); re-run pack_params"

    Nq, Nk = lay["Nq"], lay["Nk"]
    # One stacked input array -> one DMA, and it lets the kernel fuse the
    # Q/K/V projections into a single matmul.
    x = jnp.concatenate([q.reshape(Nq, D), k.reshape(Nk, D)], axis=0)

    kernel = functools.partial(
        _mha_kernel, D=D, H=H, band=lay["band"], Wo=lay["Wo"], Nq=Nq, Nk=Nk,
        r_bqkv=lay["r_bqkv"], r_wo=lay["r_wo"], r_bo=lay["r_bo"],
        r_mask=lay["r_mask"])

    # No grid / no BlockSpecs: every (tiny) operand is brought whole into VMEM
    # and the kernel runs as a single invocation (3 refs total).
    out = pl.pallas_call(
        kernel,
        out_shape=jax.ShapeDtypeStruct((Nq, lay["Wo"]), q.dtype),
    )(x, packed_buf)
    return out[:, :D].reshape(B, Sq, D)


def init_params(key, inputs):
    """Deterministic param init mimicking nn.Linear's uniform(-1/sqrt(fan_in), +).
    Weights stored as (in_features, out_features) so x @ W + b."""
    hiddens = inputs * 2

    def linear(key, fan_in, fan_out):
        kw, kb = jax.random.split(key)
        bound = 1.0 / math.sqrt(fan_in)
        w = jax.random.uniform(kw, (fan_in, fan_out), jnp.float32, -bound, bound)
        b = jax.random.uniform(kb, (1, fan_out), jnp.float32, -bound, bound)
        return w, b

    k1, k2, k3, k4 = jax.random.split(key, 4)
    wq, bq = linear(k1, inputs, hiddens)
    wk, bk = linear(k2, inputs, hiddens)
    wv, bv = linear(k3, inputs, hiddens)
    wo, bo = linear(k4, hiddens, inputs)
    return dict(wq=wq, bq=bq, wk=wk, bk=bk, wv=wv, bv=bv, wo=wo, bo=bo)


def pack_params(params, B, Sq, Sk):
    """One-time host-side packing: fold 1/sqrt(H) into the Q projection and lay
    every weight, bias and the block-diagonal additive mask into a single
    lane-padded (rows, W) f32 buffer (one kernel ref, one DMA)."""
    D, H = params["wq"].shape
    lay = _layout(D, H, B, Sq, Sk)
    band, W = lay["band"], lay["W"]
    scale = 1.0 / math.sqrt(H)

    buf = np.zeros((lay["rows"], W), np.float32)
    # Fused projection weight: wq (scaled) | wk | wv, each in its own 128-band.
    buf[0:D, 0:H] = np.asarray(params["wq"]) * scale
    buf[0:D, band:band + H] = np.asarray(params["wk"])
    buf[0:D, 2 * band:2 * band + H] = np.asarray(params["wv"])
    # Fused projection bias.
    buf[lay["r_bqkv"], 0:H] = np.asarray(params["bq"])[0] * scale
    buf[lay["r_bqkv"], band:band + H] = np.asarray(params["bk"])[0]
    buf[lay["r_bqkv"], 2 * band:2 * band + H] = np.asarray(params["bv"])[0]
    # Output projection, zero-padded to a lane-dense Wo-wide block.
    buf[lay["r_wo"]:lay["r_wo"] + H, 0:D] = np.asarray(params["wo"])
    buf[lay["r_bo"], 0:D] = np.asarray(params["bo"])[0]
    # Additive block-diagonal mask (0 on the diagonal blocks, -1e30 elsewhere).
    Nq, Nk = lay["Nq"], lay["Nk"]
    row_b = np.arange(Nq)[:, None] // Sq
    col_b = np.arange(Nk)[None, :] // Sk
    buf[lay["r_mask"]:lay["r_mask"] + Nq, 0:Nk] = np.where(
        row_b == col_b, 0.0, -1e30).astype(np.float32)
    return jnp.asarray(buf)


def reference(q, k, params):
    """Pure-JAX reference of the PyTorch forward (dropouts are Identity)."""
    qh = q @ params["wq"] + params["bq"][0]
    kh = k @ params["wk"] + params["bk"][0]
    vh = k @ params["wv"] + params["bv"][0]
    scores = jnp.einsum("bqh,bkh->bqk", qh, kh) / math.sqrt(qh.shape[-1])
    attn = jax.nn.softmax(scores, axis=-1)
    ctx = jnp.einsum("bqk,bkh->bqh", attn, vh)
    return ctx @ params["wo"] + params["bo"][0]


if __name__ == "__main__":
    B, Sq, Sk, D = 2, 8, 8, 32   # inputs=32 -> hiddens=64

    key = jax.random.PRNGKey(0)
    kq, kk, kp = jax.random.split(key, 3)
    q = jax.random.normal(kq, (B, Sq, D), jnp.float32)
    k = jax.random.normal(kk, (B, Sk, D), jnp.float32)

    params = init_params(kp, D)
    packed = pack_params(params, B, Sq, Sk)

    out = multi_head_attention(q, k, packed)
    out = jax.block_until_ready(out)

    ref = reference(q, k, params)
    assert out.shape == (B, Sq, D)
    err = float(jnp.max(jnp.abs(out - ref)))
    # approx reciprocal in the softmax denominator costs a few ulps of relative
    # accuracy; 1e-3 still catches any structural / masking / packing bug.
    assert jnp.allclose(out, ref, atol=1e-3, rtol=1e-3), f"max abs err {err}"

    print("KERNEL_OK")
</pallas_src>

<mosaic_0001>
module attributes {stable_mosaic.version = 11 : i64} {
  func.func @_mha_kernel(%arg0: memref<32x32xf32, #tpu.memory_space<vmem>>, %arg1: memref<128x384xf32, #tpu.memory_space<vmem>>, %arg2: memref<16x128xf32, #tpu.memory_space<vmem>>) attributes {dimension_semantics = [], scalar_prefetch = 0 : i64, scratch_operands = 0 : i64, tpu.core_type = #tpu.core_type<tc>} {
    %c0 = arith.constant 0 : index
    %c0_0 = arith.constant 0 : index
    %0 = vector.load %arg0[%c0, %c0_0] : memref<32x32xf32, #tpu.memory_space<vmem>>, vector<32x32xf32>
    %c0_1 = arith.constant 0 : index
    %c0_2 = arith.constant 0 : index
    %1 = vector.load %arg1[%c0_1, %c0_2] : memref<128x384xf32, #tpu.memory_space<vmem>>, vector<32x384xf32>
    %c32 = arith.constant 32 : index
    %c0_3 = arith.constant 0 : index
    %2 = vector.load %arg1[%c32, %c0_3] : memref<128x384xf32, #tpu.memory_space<vmem>>, vector<1x384xf32>
    %cst = arith.constant dense<0.000000e+00> : vector<32x384xf32>
    %3 = tpu.matmul %0, %1, %cst {dimension_numbers = #tpu.dot_dimension_numbers<[1], [0], [0], [1], [0, 0, 1, 1], [], []>} : vector<32x32xf32>, vector<32x384xf32>, vector<32x384xf32> -> vector<32x384xf32>
    %4 = vector.broadcast %2 : vector<1x384xf32> to vector<32x384xf32>
    %5 = arith.addf %3, %4 : vector<32x384xf32>
    %6 = vector.extract_strided_slice %5 {offsets = [0, 0], sizes = [16, 64], strides = [1, 1]} : vector<32x384xf32> to vector<16x64xf32>
    %7 = vector.extract_strided_slice %5 {offsets = [16, 128], sizes = [16, 64], strides = [1, 1]} : vector<32x384xf32> to vector<16x64xf32>
    %8 = vector.extract_strided_slice %5 {offsets = [16, 256], sizes = [16, 64], strides = [1, 1]} : vector<32x384xf32> to vector<16x64xf32>
    %cst_4 = arith.constant dense<0.000000e+00> : vector<16x16xf32>
    %9 = tpu.matmul %6, %7, %cst_4 {dimension_numbers = #tpu.dot_dimension_numbers<[1], [1], [0], [0], [0, 0, 1, 0], [], []>} : vector<16x64xf32>, vector<16x64xf32>, vector<16x16xf32> -> vector<16x16xf32>
    %c112 = arith.constant 112 : index
    %c0_5 = arith.constant 0 : index
    %10 = vector.load %arg1[%c112, %c0_5] : memref<128x384xf32, #tpu.memory_space<vmem>>, vector<16x16xf32>
    %11 = arith.addf %9, %10 : vector<16x16xf32>
    %cst_6 = arith.constant dense<0xFF800000> : vector<16xf32>
    %12 = vector.multi_reduction <maximumf>, %11, %cst_6 [1] : vector<16x16xf32> to vector<16xf32>
    %13 = vector.shape_cast %12 : vector<16xf32> to vector<16x1xf32>
    %14 = vector.broadcast %13 : vector<16x1xf32> to vector<16x16xf32>
    %15 = arith.subf %11, %14 : vector<16x16xf32>
    %16 = math.exp %15 : vector<16x16xf32>
    %cst_7 = arith.constant dense<0.000000e+00> : vector<16xf32>
    %17 = vector.multi_reduction <add>, %16, %cst_7 [1] : vector<16x16xf32> to vector<16xf32>
    %18 = vector.shape_cast %17 : vector<16xf32> to vector<16x1xf32>
    %19 = tpu.reciprocal %18 {approx = true} : vector<16x1xf32> -> vector<16x1xf32>
    %20 = vector.broadcast %19 : vector<16x1xf32> to vector<16x16xf32>
    %21 = arith.mulf %16, %20 : vector<16x16xf32>
    %cst_8 = arith.constant dense<0.000000e+00> : vector<16x64xf32>
    %22 = tpu.matmul %21, %8, %cst_8 {dimension_numbers = #tpu.dot_dimension_numbers<[1], [0], [0], [1], [0, 0, 1, 1], [], []>} : vector<16x16xf32>, vector<16x64xf32>, vector<16x64xf32> -> vector<16x64xf32>
    %c40 = arith.constant 40 : index
    %c0_9 = arith.constant 0 : index
    %23 = vector.load %arg1[%c40, %c0_9] : memref<128x384xf32, #tpu.memory_space<vmem>>, vector<64x128xf32>
    %c104 = arith.constant 104 : index
    %c0_10 = arith.constant 0 : index
    %24 = vector.load %arg1[%c104, %c0_10] : memref<128x384xf32, #tpu.memory_space<vmem>>, vector<1x128xf32>
    %cst_11 = arith.constant dense<0.000000e+00> : vector<16x128xf32>
    %25 = tpu.matmul %22, %23, %cst_11 {dimension_numbers = #tpu.dot_dimension_numbers<[1], [0], [0], [1], [0, 0, 1, 1], [], []>} : vector<16x64xf32>, vector<64x128xf32>, vector<16x128xf32> -> vector<16x128xf32>
    %26 = vector.broadcast %24 : vector<1x128xf32> to vector<16x128xf32>
    %27 = arith.addf %25, %26 : vector<16x128xf32>
    %c0_12 = arith.constant 0 : index
    %c0_13 = arith.constant 0 : index
    %28 = vector.load %arg2[%c0_12, %c0_13] : memref<16x128xf32, #tpu.memory_space<vmem>>, vector<16x128xf32>
    tpu.vector_store %arg2[%c0_12, %c0_13], %27 {strides = array<i32>} : memref<16x128xf32, #tpu.memory_space<vmem>>, vector<16x128xf32>,
    return
  }
}

</mosaic_0001>

<bundles_post_ra>
// kernel: tpu_custom_call.1
= control target key start
LH: loop header
LB: loop body
LE: loop exit
PB: predicated region body
PF: predicated region fallthrough
CT: control target
= control target key end

     0   :  { %7 = vsyncpa [#allocation3], 0  ;;  %s863_s0 = inlined_call_operand.hbm [shape: f32[32,32], index: 0, kind: input, shape index: {}]   ;;  %s864_s1 = inlined_call_operand.hbm [shape: f32[128,384], index: 1, kind: input, shape index: {}]   ;;  %s865_s2 = inlined_call_operand.hbm [shape: f32[16,128], index: 2, kind: output, shape index: {}]  }
   0x1   :  { %8 = vsyncpa [#allocation6], 0 }
   0x2   :  { %9 = vsyncpa [#allocation4], 0  ;;  %s778_s9 = smov [#allocation2]   ;;  %s706_s13 = scalar_lea.hbm %s863_s0, 512 }
   0x3   :  { %s15_s10 = sshll.u32 %s778_s9, 4  ;;  %p707_p0 = scmp.ne.s32.totalorder %s863_s0, %s706_s13  ;;  %s16_s10 = int_to_ptr.vmem [resolvable:$true] %s15_s10 }
   0x4   :  { %p710_p1 = scmp.lt.u32.totalorder %s706_s13, %s863_s0 }
   0x6   :  { %p712_p2 = pnand %p710_p1, %p707_p0 }
   0x8   :  { %715 = shalt.err (!%p712_p2)
}
   0x9   :  { %s716_s18 = scalar_lea.vmem %s16_s10, 512  ;;  %p721_p4 = scmp.lt.s32.totalorder %s16_s10, %s16_s10 }
   0xa   :  { %p717_p3 = scmp.ne.s32.totalorder %s16_s10, %s716_s18  ;;  %p722_p5 = scmp.lt.s32.totalorder %s716_s18, %s716_s18 }
   0xc   :  { %p723_p6 = por %p722_p5, %p721_p4 }
   0xe   :  { %p724_p7 = pnand %p723_p6, %p717_p3 }
  0x10   :  { %727 = shalt.err (!%p724_p7)
}
  0x11   :  { %s779_s19 = smov 128   ;;  %s780_s20 = smov 8  }
  0x12   :  { %21 = dma.hbm_to_vmem [thread:$0]  %s863_s0, 512, %s16_s10, [#allocation3], %s779_s19, %s779_s19, %s780_s20  }
  0x13   :  { %s781_s23 = smov [#allocation5]   ;;  %s728_s27 = scalar_lea.hbm %s864_s1, 6144 }
  0x14   :  { %s27_s24 = sshll.u32 %s781_s23, 4  ;;  %p729_p8 = scmp.ne.s32.totalorder %s864_s1, %s728_s27  ;;  %s28_s24 = int_to_ptr.vmem [resolvable:$true] %s27_s24 }
  0x15   :  { %p732_p9 = scmp.lt.u32.totalorder %s728_s27, %s864_s1 }
  0x17   :  { %p734_p10 = pnand %p732_p9, %p729_p8 }
  0x19   :  { %737 = shalt.err (!%p734_p10)
}
  0x1a   :  { %s738_s4 = scalar_lea.vmem %s28_s24, 6144  ;;  %p743_p12 = scmp.lt.s32.totalorder %s28_s24, %s28_s24 }
  0x1b   :  { %p739_p11 = scmp.ne.s32.totalorder %s28_s24, %s738_s4  ;;  %p744_p13 = scmp.lt.s32.totalorder %s738_s4, %s738_s4 }
  0x1d   :  { %p745_p0 = por %p744_p13, %p743_p12 }
  0x1f   :  { %p746_p1 = pnand %p745_p0, %p739_p11 }
  0x21   :  { %749 = shalt.err (!%p746_p1)
}
  0x22   :  { %s782_s0 = smov 384   ;;  %s783_s5 = smov 24  }
  0x23   :  { %33 = dma.hbm_to_vmem [thread:$0]  %s864_s1, 6144, %s28_s24, [#allocation6], %s782_s0, %s782_s0, %s783_s5  }
  0x24   :  { %772 = dma.done.wait [#allocation3], 512  }
  0x25   :  { %773 = vsyncadd [#allocation3], 4294966784 }
  0x26   :  { %774 = dma.done.wait [#allocation6], 6144  }
  0x27   :  { %775 = vsyncadd [#allocation6], 4294961152  ;;  %v784_v0 = vmov 0.0   ;;  %v45_v1 = vld [vmem:[#allocation5 + $0x8] sm:$0xff]  ;;  %v48_v2 = vld [vmem:[#allocation5 + $0x20] sm:$0xff]  ;;  %vm74_vm0 = vcmask 261120   ;;  %v59_v23 = vlaneseq }
  0x28   :  { %151 = vmatprep.mubr.f32.mxu0 %v784_v0  ;;  %v44_v3 = vld [vmem:[#allocation5] sm:$0xff]  ;;  %v648_v4 = vpack.c.bf16 %v48_v2, %v45_v1  ;;  %v47_v5 = vld [vmem:[#allocation5 + $0x18] sm:$0xff]  ;;  %v54_v7 = vld [vmem:[#allocation5 + $0x50] sm:$0xff]  ;;  %vm257_vm1 = vcmask 523264   ;;  %vm345_vm3 = vcmask 130048   ;;  %s785_s1 = smov [#allocation7]  }
  0x29   :  { %v51_v6 = vld [vmem:[#allocation5 + $0x38] sm:$0xff]  ;;  %v650_v8 = vpack.c.bf16 %v47_v5, %v44_v3  ;;  %v50_v10 = vld [vmem:[#allocation5 + $0x30] sm:$0xff]  ;;  %v53_v11 = vld [vmem:[#allocation5 + $0x48] sm:$0xff]  ;;  %v60_v24 = vshrl.u32 %v59_v23, 7  ;;  %s546_s8 = sshll.u32 %s785_s1, 4  ;;  %s547_s8 = int_to_ptr.vmem [resolvable:$true] %s546_s8 }
  0x2a   :  { %v652_v9 = vpack.c.bf16 %v54_v7, %v51_v6  ;;  %v40_v12 = vld [vmem:[#allocation2] sm:$0xff]  ;;  %649 = vmatprep.subr.bf16.mxu0 %v648_v4  ;;  %v654_v13 = vpack.c.bf16 %v53_v11, %v50_v10  ;;  %v46_v14 = vld [vmem:[#allocation5 + $0x10] sm:$0xff]  ;;  %v49_v15 = vld [vmem:[#allocation5 + $0x28] sm:$0xff]  ;;  %s750_s9 = scalar_lea.vmem %s547_s8, 256  ;;  %p755_p3 = scmp.lt.s32.totalorder %s547_s8, %s547_s8 }
  0x2b   :  { %609 = vmatprep.mubr.msk.f32.mxu1 %vm74_vm0, %v40_v12  ;;  %651 = vmatpush1.bf16.msra.mxu0 %v650_v8  ;;  %v52_v16 = vld [vmem:[#allocation5 + $0x40] sm:$0xff]  ;;  %v656_v17 = vpack.c.bf16 %v49_v15, %v46_v14  ;;  %v55_v18 = vld [vmem:[#allocation5 + $0x58] sm:$0xff]  ;;  %v41_v20 = vld [vmem:[#allocation2 + $0x8] sm:$0xff]  ;;  %v61_v25 = vsub.s32 0, %v60_v24  ;;  %v69_v31 = vsub.s32 2, %v60_v24  ;;  %v65_v37 = vsub.s32 1, %v60_v24  ;;  %p751_p2 = scmp.ne.s32.totalorder %s547_s8, %s750_s9  ;;  %p756_p4 = scmp.lt.s32.totalorder %s750_s9, %s750_s9 }
  0x2c   :  { %653 = vmatprep.subr.bf16.mxu0 %v652_v9  ;;  %v660_v19 = vpack.c.bf16 %v55_v18, %v52_v16  ;;  %v42_v21 = vld [vmem:[#allocation2 + $0x10] sm:$0xff]  ;;  %v43_v22 = vld [vmem:[#allocation2 + $0x18] sm:$0xff]  ;;  %vm665_vm2 = vmpackc.low %vm257_vm1, %vm257_vm1 }
  0x2d   :  { %657 = vmatprep.subr.bf16.mxu1 %v656_v17  ;;  %v57_v26 = vld [vmem:[#allocation5 + $0x60] ss:$8 sm:$0x7]  ;;  %v449_v6 = vld [vmem:[#allocation5 + $0x78] sm:$0xff]  ;;  %p757_p5 = por %p756_p4, %p755_p3 }
  0x2e   :  { %659 = vmatpush3.bf16.msra.mxu1 %v656_v17  ;;  %v62_v27 = vrot.slane %v57_v26, %v61_v25  ;;  %v70_v36 = vrot.slane %v57_v26, %v69_v31  ;;  %v66_v43 = vrot.slane %v57_v26, %v65_v37  ;;  %v255_v52 = vld [vmem:[#allocation5 + $0x150] sm:$0xff]  ;;  %v256_v54 = vld [vmem:[#allocation5 + $0x168] sm:$0xff]  ;;  %v452_v10 = vld [vmem:[#allocation5 + $0xc0] sm:$0xff] }
  0x2f   :  { %655 = vmatpush1.bf16.msra.mxu0 %v654_v13  ;;  %661 = vmatprep.subr.bf16.mxu1 %v660_v19  ;;  %v450_v7 = vld [vmem:[#allocation5 + $0x90] sm:$0xff]  ;;  %v451_v8 = vld [vmem:[#allocation5 + $0xa8] sm:$0xff]  ;;  %v456_v16 = vld [vmem:[#allocation5 + $0x120] sm:$0xff]  ;;  %p758_p6 = pnand %p757_p5, %p751_p2 }
  0x30   :  { %v674_v9 = vpack.c.bf16 %v450_v7, %v449_v6  ;;  %v678_v11 = vpack.c.bf16 %v452_v10, %v451_v8  ;;  %v454_v13 = vld [vmem:[#allocation5 + $0xf0] sm:$0xff]  ;;  %v455_v15 = vld [vmem:[#allocation5 + $0x108] sm:$0xff]  ;;  %v457_v26 = vld [vmem:[#allocation5 + $0x138] ss:$0 sm:$0xff] }
  0x31   :  { %v686_v17 = vpack.c.bf16 %v456_v16, %v455_v15 }
  0x32   :  { %559 = vmatmul.mubr.msk.f32.vlgmr.msra.gmra.mrb[0].mxu0 %vm74_vm0, %v40_v12  ;;  %663 = vmatpush3.bf16.msra.mxu1 %v660_v19  ;;  %v453_v12 = vld [vmem:[#allocation5 + $0xd8] sm:$0xff] }
  0x33   :  { %156 = vmatprep.mubr.f32.mxu0 %v784_v0  ;;  %675 = vmatprep.subr.bf16.mxu0 %v674_v9  ;;  %v682_v14 = vpack.c.bf16 %v454_v13, %v453_v12 }
  0x34   :  { %677 = vmatpush3.bf16.msra.mxu0 %v674_v9 }
  0x35   :  { %610 = vmatmul.mubr.msk.f32.vlgmr.msra.gmra.mrb[0].mxu1 %vm74_vm0, %v41_v20  ;;  %679 = vmatprep.subr.bf16.mxu0 %v678_v11 }
  0x36   :  { %560 = vmatmul.mubr.msk.f32.gmra.mrb[2].mxu0 %vm74_vm0, %v41_v20  ;;  %612 = vmatprep.mubr.msk.f32.mxu1 %vm74_vm0, %v42_v21 }
  0x37   :  { %161 = vmatprep.mubr.f32.mxu0 %v784_v0 }
  0x38   :  { %681 = vmatpush3.bf16.msra.mxu0 %v678_v11 }
  0x39   :  { %613 = vmatmul.mubr.msk.f32.gmra.mrb[2].mxu1 %vm74_vm0, %v43_v22  ;;  %683 = vmatprep.subr.bf16.mxu0 %v682_v14 }
  0x3a   :  { %561 = vmatmul.mubr.msk.f32.gmra.mrb[4].mxu0 %vm74_vm0, %v42_v21 }
  0x3b   :  { %166 = vmatprep.mubr.f32.mxu0 %v784_v0 }
  0x3c   :  { %685 = vmatpush3.bf16.msra.mxu0 %v682_v14 }
  0x3d   :  { %687 = vmatprep.subr.bf16.mxu0 %v686_v17 }
  0x3e   :  { %562 = vmatmul.mubr.msk.f32.gmra.mrb[6].mxu0 %vm74_vm0, %v43_v22 }
  0x40   :  { %689 = vmatpush3.bf16.msra.mxu0 %v686_v17 }
 0x105   :  { %v153_v28 = vpop.f32.mrb[0].mxu0 }
 0x106   :  { %v154_v29 = vadd.f32 %v153_v28, %v62_v27  ;;  %v155_v30 = vpop.f32.mrb[1].mxu0 }
 0x108   :  { %619 = vmatprep.mubr.msk.f32.mxu1 %vm257_vm1, %v154_v29  ;;  %v611_v33 = vpop.f32.mrb[0].mxu1 }
 0x109   :  { %v158_v32 = vpop.f32.mrb[2].mxu0  ;;  %v238_v35 = vpop.f32.mrb[1].mxu1 }
 0x10a   :  { %v160_v34 = vpop.f32.mrb[3].mxu0  ;;  %v159_v51 = vadd.f32 %v158_v32, %v62_v27 }
 0x10c   :  { %v614_v39 = vpop.f32.mrb[2].mxu1 }
 0x10d   :  { %v163_v38 = vpop.f32.mrb[4].mxu0  ;;  %v252_v41 = vadd.f32 %v614_v39, %v70_v36  ;;  %v246_v42 = vpop.f32.mrb[3].mxu1 }
 0x10e   :  { %v164_v40 = vpop.f32.mrb[5].mxu0  ;;  %v247_v44 = vadd.f32 %v246_v42, %v70_v36 }
 0x10f   :  { %v165_v48 = vadd.f32 %v164_v40, %v66_v43 }
 0x110   :  { %v670_v46 = vpack.c.bf16 %v252_v41, %v247_v44 }
 0x111   :  { %v168_v45 = vpop.f32.mrb[6].mxu0 }
 0x112   :  { %v169_v47 = vpop.f32.mrb[7].mxu0 }
 0x113   :  { %v170_v49 = vadd.f32 %v169_v47, %v66_v43 }
 0x115   :  { %v664_v50 = vpack.c.bf16 %v170_v49, %v165_v48 }
 0x117   :  { %666 = vmatprep.subr.msk.bf16.mxu1 %vm665_vm2, %v664_v50 }
 0x118   :  { %669 = vmatpush3.bf16.xpose.msk.msra.mxu1 %vm665_vm2, %v664_v50 }
 0x119   :  { %671 = vmatprep.subr.bf16.mxu1 %v670_v46 }
 0x11f   :  { %620 = vmatmul.mubr.msk.f32.vlgmr.msra.gmra.mrb[4].mxu1 %vm257_vm1, %v159_v51 }
 0x120   :  { %673 = vmatpush3.bf16.msra.mxu1 %v670_v46 }
 0x1f2   :  { %v621_v53 = vpop.f32.mrb[4].mxu1 }
 0x1f3   :  { %v336_v55 = vpop.f32.mrb[5].mxu1  ;;  %v342_v57 = vadd.f32 %v621_v53, %v256_v54 }
 0x1f4   :  { %v337_v56 = vadd.f32 %v336_v55, %v255_v52 }
 0x1f5   :  { %v349_v59 = vsel %vm345_vm3, %v342_v57, -inf }
 0x1f6   :  { %v346_v58 = vsel %vm345_vm3, %v337_v56, -inf }
 0x1f7   :  { %347 = vmax.xlane.f32.xlu0 %v346_v58 }
 0x1fb   :  { %350 = vmax.xlane.f32.xlu0 %v349_v59 }
 0x284   :  { %v348_v60 = vpop.xlane.xlu0 %347 }
 0x285   :  { %v352_v61 = vsub.f32 %v337_v56, %v348_v60 }
 0x287   :  { %v354_v62 = vmul.f32 1.442695, %v352_v61 }
 0x288   :  { %v351_v63 = vpop.xlane.xlu0 %350 }
 0x289   :  { %698 = vpow2.f32 %v354_v62  ;;  %v353_v0 = vsub.f32 %v342_v57, %v351_v63 }
 0x28b   :  { %v356_v1 = vmul.f32 1.442695, %v353_v0 }
 0x28d   :  { %700 = vpow2.f32 %v356_v1 }
 0x293   :  { %v699_v2 = vpop.eup %698 }
 0x294   :  { %v358_v3 = vsel %vm345_vm3, %v699_v2, 0.0 }
 0x295   :  { %359 = vadd.xlane.f32.xlu1 %v358_v3 }
 0x297   :  { %v701_v4 = vpop.eup %700 }
 0x298   :  { %v361_v5 = vsel %vm345_vm3, %v701_v4, 0.0 }
 0x299   :  { %362 = vadd.xlane.f32.xlu1 %v361_v5 }
 0x322   :  { %v360_v18 = vpop.xlane.xlu1 %359 }
 0x323   :  { %702 = vrcp.f32 %v360_v18 }
 0x326   :  { %v363_v19 = vpop.xlane.xlu1 %362 }
 0x327   :  { %704 = vrcp.f32 %v363_v19 }
 0x32d   :  { %v703_v20 = vpop.eup %702 }
 0x32e   :  { %v366_v21 = vmul.f32 %v703_v20, %v699_v2 }
 0x330   :  { %626 = vmatprep.mubr.msk.f32.mxu1 %vm345_vm3, %v366_v21 }
 0x331   :  { %v705_v22 = vpop.eup %704 }
 0x332   :  { %v367_v23 = vmul.f32 %v705_v22, %v701_v4 }
 0x334   :  { %627 = vmatmul.mubr.msk.f32.vlgmr.msra.gmra.mrb[6].mxu1 %vm345_vm3, %v367_v23 }
 0x407   :  { %v628_v24 = vpop.f32.mrb[6].mxu1 }
 0x408   :  { %v440_v25 = vpop.f32.mrb[7].mxu1 }
 0x409   :  { %645 = vmatprep.mubr.msk.f32.mxu0 %vm257_vm1, %v440_v25 }
 0x40a   :  { %646 = vmatmul.mubr.msk.f32.vlgmr.msra.gmra.mrb[8].mxu0 %vm257_vm1, %v628_v24 }
 0x4dd   :  { %v647_v27 = vpop.f32.mrb[8].mxu0 }
 0x4de   :  { %v536_v28 = vadd.f32 %v647_v27, %v457_v26  ;;  %v530_v29 = vpop.f32.mrb[9].mxu0 }
 0x4df   :  { %v531_v30 = vadd.f32 %v530_v29, %v457_v26 }
 0x4e0   :  { %540 = vst [vmem:[#allocation7 + $0x8] sm:$0xff] %v536_v28 }
 0x4e1   :  { %539 = vst [vmem:[#allocation7] sm:$0xff] %v531_v30 }
 0x4e2   :  { %761 = shalt.err (!%p758_p6)
}
 0x4e3   :  { %s762_s12 = scalar_lea.hbm %s865_s2, 256 }
 0x4e4   :  { %p763_p7 = scmp.ne.s32.totalorder %s865_s2, %s762_s12  ;;  %p766_p8 = scmp.lt.u32.totalorder %s762_s12, %s865_s2 }
 0x4e6   :  { %p768_p9 = pnand %p766_p8, %p763_p7 }
 0x4e8   :  { %771 = shalt.err (!%p768_p9)
}
 0x4e9   :  { %552 = dma.vmem_to_hbm [thread:$0]  %s547_s8, 256, %s865_s2, [#allocation4], %s779_s19, %s779_s19, %s780_s20  }
 0x4ea   :  { %776 = dma.done.wait [#allocation4], 256  }
 0x4eb   :  { %777 = vsyncadd [#allocation4], 4294967040 }
 0x4ec   :  { %556 = vsyncpa [#allocation3], 1 }
 0x4ed   :  { %557 = vsyncpa [#allocation6], 1 }
 0x4ee   :  { %558 = vsyncpa [#allocation4], 1 }

</bundles_post_ra>
